<compile_context>
chip_gen: v5e
topology: v5e:2x2
jax: 0.10.0
libtpu: 0.0.40
codegen_flags: <defaults>
</compile_context>

<pallas_src>
import jax
import jax.numpy as jnp
from jax import lax
from jax.experimental import pallas as pl
from jax.experimental.pallas import tpu as pltpu

BN_EPS = 1e-5
L2_EPS = 1e-12


def _dynamic_layer_kernel(adj_ref, x_ref, w_ref, gamma_ref, beta_ref, o_ref):
    """Single program: one big A@X matmul, unrolled snapshot sum, BN/ReLU/L2 epilogue."""
    n_nodes, d_out = o_ref.shape
    n_snap = w_ref.shape[0]

    # Stage 1: Z = vstack_s(A_s) @ X  as ONE MXU matmul:  [S*N, N] x [N, Din]
    # (bf16 operands, f32 accumulation; Z_s == A_s @ X lives at rows [s*N, (s+1)*N)).
    z = jnp.dot(adj_ref[...], x_ref[...], preferred_element_type=jnp.float32)
    z = z.astype(jnp.bfloat16)

    # Stage 2: aggregation == 'sum' -> Y = sum_s Z_s @ W_s (statically unrolled,
    # loop-carried f32 accumulator, no VMEM scratch).
    y = jnp.zeros((n_nodes, d_out), jnp.float32)
    for s in range(n_snap):
        z_s = z[s * n_nodes:(s + 1) * n_nodes, :]
        y = y + jnp.dot(z_s, w_ref[s], preferred_element_type=jnp.float32)

    # BatchNorm1d over the node (batch) dim, training-mode biased batch stats,
    # fused single-pass reduction: E[x], E[x^2].
    inv_n = 1.0 / n_nodes
    s1 = jnp.sum(y, axis=0, keepdims=True)
    s2 = jnp.sum(y * y, axis=0, keepdims=True)
    mean = s1 * inv_n
    var = jnp.maximum(s2 * inv_n - mean * mean, 0.0)
    y = (y - mean) * lax.rsqrt(var + BN_EPS)
    y = y * gamma_ref[...] + beta_ref[...]

    # ReLU
    y = jnp.maximum(y, 0.0)

    # L2 normalize along feature dim (F.normalize semantics); rsqrt on clamped
    # sum-of-squares == 1 / max(||y||, eps).
    ss = jnp.sum(y * y, axis=1, keepdims=True)
    y = y * lax.rsqrt(jnp.maximum(ss, L2_EPS * L2_EPS))

    o_ref[...] = y.astype(o_ref.dtype)


def dynamic_general_layer(adj, x, w, gamma, beta):
    """adj: [S,N,N]  x: [N,Din]  w: [S,Din,Dout]  gamma/beta: [1,Dout]."""
    S, N, _ = adj.shape
    Din = x.shape[1]
    Dout = w.shape[2]

    # Lane-dense output path: pad the OUTPUT feature dim to a multiple of 128. Padded
    # weight columns are zero -> padded features stay exactly 0 through BN
    # (gamma_pad=1, beta_pad=0), ReLU and the L2 norm; sliced off at the end.
    Dp = ((Dout + 127) // 128) * 128
    pad = Dp - Dout
    w_p = jnp.pad(w, ((0, 0), (0, 0), (0, pad)))
    gamma_p = jnp.pad(gamma, ((0, 0), (0, pad)), constant_values=1.0)
    beta_p = jnp.pad(beta, ((0, 0), (0, pad)))

    # bf16 matmul operands; accumulation stays f32 inside the kernel.
    # Adjacency stacked along rows (pure row-major reshape, no data movement).
    adj_b = adj.reshape(S * N, N).astype(jnp.bfloat16)
    x_b = x.astype(jnp.bfloat16)
    w_b = w_p.astype(jnp.bfloat16)

    out = pl.pallas_call(
        _dynamic_layer_kernel,
        out_shape=jax.ShapeDtypeStruct((N, Dp), jnp.float32),
        grid=(1,),
        in_specs=[
            pl.BlockSpec((S * N, N), lambda i: (0, 0)),      # stacked adjacency
            pl.BlockSpec((N, Din), lambda i: (0, 0)),        # x
            pl.BlockSpec((S, Din, Dp), lambda i: (0, 0, 0)), # W (all snapshots, padded)
            pl.BlockSpec((1, Dp), lambda i: (0, 0)),         # gamma
            pl.BlockSpec((1, Dp), lambda i: (0, 0)),         # beta
        ],
        out_specs=pl.BlockSpec((N, Dp), lambda i: (0, 0)),
        compiler_params=pltpu.CompilerParams(
            dimension_semantics=("arbitrary",)),
    )(adj_b, x_b, w_b, gamma_p, beta_p)

    return out[:, :Dout]


def _reference(adj, x, w, gamma, beta):
    """Pure-JAX reference of the same forward pass.

    Mirrors the kernel's mixed-precision choices (bf16-rounded matmul operands,
    bf16 intermediate Z = A @ X, f32 accumulation) so the comparison isolates the
    Pallas lowering rather than the bf16 quantization / re-association.
    """
    f32 = jnp.float32
    adj_q = adj.astype(jnp.bfloat16).astype(f32)
    x_q = x.astype(jnp.bfloat16).astype(f32)
    w_q = w.astype(jnp.bfloat16).astype(f32)

    z = jnp.einsum("snm,md->snd", adj_q, x_q, precision=lax.Precision.HIGHEST)
    z = z.astype(jnp.bfloat16).astype(f32)
    y = jnp.einsum("snd,sdo->no", z, w_q, precision=lax.Precision.HIGHEST)

    mean = jnp.mean(y, axis=0, keepdims=True)
    var = jnp.mean((y - mean) ** 2, axis=0, keepdims=True)
    y = (y - mean) / jnp.sqrt(var + BN_EPS) * gamma + beta
    y = jnp.maximum(y, 0.0)
    nrm = jnp.sqrt(jnp.sum(y * y, axis=1, keepdims=True))
    return y / jnp.maximum(nrm, L2_EPS)


def _make_normalized_adj(key, S, N):
    """Per-snapshot random graph -> GCN-normalized dense adjacency D^-1/2 (A+I) D^-1/2."""
    a = (jax.random.uniform(key, (S, N, N)) < 0.05).astype(jnp.float32)
    a = jnp.maximum(a, jnp.transpose(a, (0, 2, 1)))            # symmetric
    a = a + jnp.eye(N, dtype=jnp.float32)[None]                # self loops
    deg = jnp.sum(a, axis=-1)
    dinv = 1.0 / jnp.sqrt(jnp.maximum(deg, 1.0))
    return a * dinv[:, :, None] * dinv[:, None, :]


if __name__ == "__main__":
    S, N, Din, Dout = 3, 128, 32, 32   # num_snapshots=3, 128 nodes

    key = jax.random.PRNGKey(0)
    k_adj, k_x, k_w, k_g, k_b = jax.random.split(key, 5)

    adj = _make_normalized_adj(k_adj, S, N)
    x = jax.random.normal(k_x, (N, Din), dtype=jnp.float32)
    w = jax.random.normal(k_w, (S, Din, Dout), dtype=jnp.float32) * 0.1
    gamma = 1.0 + 0.1 * jax.random.normal(k_g, (1, Dout), dtype=jnp.float32)
    beta = 0.1 * jax.random.normal(k_b, (1, Dout), dtype=jnp.float32)

    out = dynamic_general_layer(adj, x, w, gamma, beta)
    out = jax.block_until_ready(out)

    ref = _reference(adj, x, w, gamma, beta)
    assert out.shape == (N, Dout)
    assert jnp.allclose(out, ref, atol=2e-3, rtol=2e-3), "mismatch vs reference"

    print("KERNEL_OK")
</pallas_src>

<mosaic_0001>
module attributes {stable_mosaic.version = 11 : i64} {
  func.func @_dynamic_layer_kernel(%arg0: i32, %arg1: memref<384x128xbf16, #tpu.memory_space<vmem>>, %arg2: memref<128x32xbf16, #tpu.memory_space<vmem>>, %arg3: memref<3x32x128xbf16, #tpu.memory_space<vmem>>, %arg4: memref<1x128xf32, #tpu.memory_space<vmem>>, %arg5: memref<1x128xf32, #tpu.memory_space<vmem>>, %arg6: memref<128x128xf32, #tpu.memory_space<vmem>>) attributes {dimension_semantics = [#tpu.dimension_semantics<arbitrary>], iteration_bounds = array<i64: 1>, scalar_prefetch = 0 : i64, scratch_operands = 0 : i64, tpu.core_type = #tpu.core_type<tc>, window_params = [{pipeline_mode = #tpu.pipeline_mode<synchronous>, transform_indices = @transform_0, window_bounds = array<i64: 384, 128>}, {pipeline_mode = #tpu.pipeline_mode<synchronous>, transform_indices = @transform_1, window_bounds = array<i64: 128, 32>}, {pipeline_mode = #tpu.pipeline_mode<synchronous>, transform_indices = @transform_2, window_bounds = array<i64: 3, 32, 128>}, {pipeline_mode = #tpu.pipeline_mode<synchronous>, transform_indices = @transform_3, window_bounds = array<i64: 1, 128>}, {pipeline_mode = #tpu.pipeline_mode<synchronous>, transform_indices = @transform_4, window_bounds = array<i64: 1, 128>}, {pipeline_mode = #tpu.pipeline_mode<synchronous>, transform_indices = @transform_5, window_bounds = array<i64: 128, 128>}]} {
    %c0 = arith.constant 0 : index
    %c0_0 = arith.constant 0 : index
    %0 = vector.load %arg1[%c0, %c0_0] : memref<384x128xbf16, #tpu.memory_space<vmem>>, vector<384x128xbf16>
    %c0_1 = arith.constant 0 : index
    %c0_2 = arith.constant 0 : index
    %1 = vector.load %arg2[%c0_1, %c0_2] : memref<128x32xbf16, #tpu.memory_space<vmem>>, vector<128x32xbf16>
    %cst = arith.constant dense<0.000000e+00> : vector<384x32xf32>
    %2 = tpu.matmul %0, %1, %cst {dimension_numbers = #tpu.dot_dimension_numbers<[1], [0], [0], [1], [0, 0, 1, 1], [], []>} : vector<384x128xbf16>, vector<128x32xbf16>, vector<384x32xf32> -> vector<384x32xf32>
    %3 = arith.truncf %2 : vector<384x32xf32> to vector<384x32xbf16>
    %cst_3 = arith.constant 0.000000e+00 : f32
    %4 = vector.broadcast %cst_3 : f32 to vector<128x128xf32>
    %5 = vector.extract_strided_slice %3 {offsets = [0, 0], sizes = [128, 32], strides = [1, 1]} : vector<384x32xbf16> to vector<128x32xbf16>
    %c0_4 = arith.constant 0 : index
    %c0_5 = arith.constant 0 : index
    %c0_6 = arith.constant 0 : index
    %6 = vector.load %arg3[%c0_4, %c0_5, %c0_6] : memref<3x32x128xbf16, #tpu.memory_space<vmem>>, vector<1x32x128xbf16>
    %7 = vector.shape_cast %6 : vector<1x32x128xbf16> to vector<32x128xbf16>
    %cst_7 = arith.constant dense<0.000000e+00> : vector<128x128xf32>
    %8 = tpu.matmul %5, %7, %cst_7 {dimension_numbers = #tpu.dot_dimension_numbers<[1], [0], [0], [1], [0, 0, 1, 1], [], []>} : vector<128x32xbf16>, vector<32x128xbf16>, vector<128x128xf32> -> vector<128x128xf32>
    %9 = arith.addf %4, %8 : vector<128x128xf32>
    %10 = vector.extract_strided_slice %3 {offsets = [128, 0], sizes = [128, 32], strides = [1, 1]} : vector<384x32xbf16> to vector<128x32xbf16>
    %c1 = arith.constant 1 : index
    %c0_8 = arith.constant 0 : index
    %c0_9 = arith.constant 0 : index
    %11 = vector.load %arg3[%c1, %c0_8, %c0_9] : memref<3x32x128xbf16, #tpu.memory_space<vmem>>, vector<1x32x128xbf16>
    %12 = vector.shape_cast %11 : vector<1x32x128xbf16> to vector<32x128xbf16>
    %cst_10 = arith.constant dense<0.000000e+00> : vector<128x128xf32>
    %13 = tpu.matmul %10, %12, %cst_10 {dimension_numbers = #tpu.dot_dimension_numbers<[1], [0], [0], [1], [0, 0, 1, 1], [], []>} : vector<128x32xbf16>, vector<32x128xbf16>, vector<128x128xf32> -> vector<128x128xf32>
    %14 = arith.addf %9, %13 : vector<128x128xf32>
    %15 = vector.extract_strided_slice %3 {offsets = [256, 0], sizes = [128, 32], strides = [1, 1]} : vector<384x32xbf16> to vector<128x32xbf16>
    %c2 = arith.constant 2 : index
    %c0_11 = arith.constant 0 : index
    %c0_12 = arith.constant 0 : index
    %16 = vector.load %arg3[%c2, %c0_11, %c0_12] : memref<3x32x128xbf16, #tpu.memory_space<vmem>>, vector<1x32x128xbf16>
    %17 = vector.shape_cast %16 : vector<1x32x128xbf16> to vector<32x128xbf16>
    %cst_13 = arith.constant dense<0.000000e+00> : vector<128x128xf32>
    %18 = tpu.matmul %15, %17, %cst_13 {dimension_numbers = #tpu.dot_dimension_numbers<[1], [0], [0], [1], [0, 0, 1, 1], [], []>} : vector<128x32xbf16>, vector<32x128xbf16>, vector<128x128xf32> -> vector<128x128xf32>
    %19 = arith.addf %14, %18 : vector<128x128xf32>
    %cst_14 = arith.constant dense<0.000000e+00> : vector<128xf32>
    %20 = vector.multi_reduction <add>, %19, %cst_14 [0] : vector<128x128xf32> to vector<128xf32>
    %21 = vector.shape_cast %20 : vector<128xf32> to vector<1x128xf32>
    %22 = arith.mulf %19, %19 : vector<128x128xf32>
    %cst_15 = arith.constant dense<0.000000e+00> : vector<128xf32>
    %23 = vector.multi_reduction <add>, %22, %cst_15 [0] : vector<128x128xf32> to vector<128xf32>
    %24 = vector.shape_cast %23 : vector<128xf32> to vector<1x128xf32>
    %cst_16 = arith.constant 7.812500e-03 : f32
    %25 = vector.broadcast %cst_16 : f32 to vector<1x128xf32>
    %26 = arith.mulf %21, %25 : vector<1x128xf32>
    %cst_17 = arith.constant 7.812500e-03 : f32
    %27 = vector.broadcast %cst_17 : f32 to vector<1x128xf32>
    %28 = arith.mulf %24, %27 : vector<1x128xf32>
    %29 = arith.mulf %26, %26 : vector<1x128xf32>
    %30 = arith.subf %28, %29 : vector<1x128xf32>
    %cst_18 = arith.constant 0.000000e+00 : f32
    %31 = vector.broadcast %cst_18 : f32 to vector<1x128xf32>
    %32 = arith.maximumf %30, %31 : vector<1x128xf32>
    %33 = vector.broadcast %26 : vector<1x128xf32> to vector<128x128xf32>
    %34 = arith.subf %19, %33 : vector<128x128xf32>
    %cst_19 = arith.constant 9.99999974E-6 : f32
    %35 = vector.broadcast %cst_19 : f32 to vector<1x128xf32>
    %36 = arith.addf %32, %35 : vector<1x128xf32>
    %37 = math.rsqrt %36 : vector<1x128xf32>
    %38 = vector.broadcast %37 : vector<1x128xf32> to vector<128x128xf32>
    %39 = arith.mulf %34, %38 : vector<128x128xf32>
    %c0_20 = arith.constant 0 : index
    %c0_21 = arith.constant 0 : index
    %40 = vector.load %arg4[%c0_20, %c0_21] : memref<1x128xf32, #tpu.memory_space<vmem>>, vector<1x128xf32>
    %41 = vector.broadcast %40 : vector<1x128xf32> to vector<128x128xf32>
    %42 = arith.mulf %39, %41 : vector<128x128xf32>
    %c0_22 = arith.constant 0 : index
    %c0_23 = arith.constant 0 : index
    %43 = vector.load %arg5[%c0_22, %c0_23] : memref<1x128xf32, #tpu.memory_space<vmem>>, vector<1x128xf32>
    %44 = vector.broadcast %43 : vector<1x128xf32> to vector<128x128xf32>
    %45 = arith.addf %42, %44 : vector<128x128xf32>
    %cst_24 = arith.constant 0.000000e+00 : f32
    %46 = vector.broadcast %cst_24 : f32 to vector<128x128xf32>
    %47 = arith.maximumf %45, %46 : vector<128x128xf32>
    %48 = arith.mulf %47, %47 : vector<128x128xf32>
    %cst_25 = arith.constant dense<0.000000e+00> : vector<128xf32>
    %49 = vector.multi_reduction <add>, %48, %cst_25 [1] : vector<128x128xf32> to vector<128xf32>
    %50 = vector.shape_cast %49 : vector<128xf32> to vector<128x1xf32>
    %cst_26 = arith.constant 1.000000e-24 : f32
    %51 = vector.broadcast %cst_26 : f32 to vector<128x1xf32>
    %52 = arith.maximumf %50, %51 : vector<128x1xf32>
    %53 = math.rsqrt %52 : vector<128x1xf32>
    %54 = vector.broadcast %53 : vector<128x1xf32> to vector<128x128xf32>
    %55 = arith.mulf %47, %54 : vector<128x128xf32>
    %c0_27 = arith.constant 0 : index
    %c0_28 = arith.constant 0 : index
    %56 = vector.load %arg6[%c0_27, %c0_28] : memref<128x128xf32, #tpu.memory_space<vmem>>, vector<128x128xf32>
    tpu.vector_store %arg6[%c0_27, %c0_28], %55 {strides = array<i32>} : memref<128x128xf32, #tpu.memory_space<vmem>>, vector<128x128xf32>,
    return
  }
  func.func @transform_0(%arg0: i32) -> (i32, i32) {
    %c0_i32 = arith.constant 0 : i32
    %c0_i32_0 = arith.constant 0 : i32
    %c0_i32_1 = arith.constant 0 : i32
    return %c0_i32, %c0_i32_0 : i32, i32
  }
  func.func @transform_1(%arg0: i32) -> (i32, i32) {
    %c0_i32 = arith.constant 0 : i32
    %c0_i32_0 = arith.constant 0 : i32
    %c0_i32_1 = arith.constant 0 : i32
    return %c0_i32, %c0_i32_0 : i32, i32
  }
  func.func @transform_2(%arg0: i32) -> (i32, i32, i32) {
    %c0_i32 = arith.constant 0 : i32
    %c0_i32_0 = arith.constant 0 : i32
    %c0_i32_1 = arith.constant 0 : i32
    %c0_i32_2 = arith.constant 0 : i32
    return %c0_i32, %c0_i32_0, %c0_i32_1 : i32, i32, i32
  }
  func.func @transform_3(%arg0: i32) -> (i32, i32) {
    %c0_i32 = arith.constant 0 : i32
    %c0_i32_0 = arith.constant 0 : i32
    %c0_i32_1 = arith.constant 0 : i32
    return %c0_i32, %c0_i32_0 : i32, i32
  }
  func.func @transform_4(%arg0: i32) -> (i32, i32) {
    %c0_i32 = arith.constant 0 : i32
    %c0_i32_0 = arith.constant 0 : i32
    %c0_i32_1 = arith.constant 0 : i32
    return %c0_i32, %c0_i32_0 : i32, i32
  }
  func.func @transform_5(%arg0: i32) -> (i32, i32) {
    %c0_i32 = arith.constant 0 : i32
    %c0_i32_0 = arith.constant 0 : i32
    %c0_i32_1 = arith.constant 0 : i32
    return %c0_i32, %c0_i32_0 : i32, i32
  }
}

</mosaic_0001>

<bundles_post_ra>
// kernel: tpu_custom_call.1
= control target key start
LH: loop header
LB: loop body
LE: loop exit
PB: predicated region body
PF: predicated region fallthrough
CT: control target
= control target key end

     0   :  { %10 = vsyncpa [#allocation3], 0  ;;  %s2213_s0 = inlined_call_operand.hbm [shape: bf16[384,128], index: 0, kind: input, shape index: {}]   ;;  %s2214_s1 = inlined_call_operand.vmem [shape: bf16[128,32], index: 1, kind: input, shape index: {}]   ;;  %s2215_s2 = inlined_call_operand.vmem [shape: bf16[3,32,128], index: 2, kind: input, shape index: {}]   ;;  %s2216_s3 = inlined_call_operand.vmem [shape: f32[1,128], index: 3, kind: input, shape index: {}]   ;;  %s2217_s4 = inlined_call_operand.vmem [shape: f32[1,128], index: 4, kind: input, shape index: {}]   ;;  %s2218_s5 = inlined_call_operand.hbm [shape: f32[128,128], index: 5, kind: output, shape index: {}]  }
   0x1   :  { %11 = vsyncpa [#allocation4], 0  ;;  %s16_s20 = sshll.u32 %s2213_s0, 4  ;;  %s1650_s21 = smov [#allocation2]   ;;  %s17_s20 = int_to_ptr.hbm [resolvable:$true] %s16_s20 }
   0x2   :  { %s18_s22 = sshll.u32 %s1650_s21, 4  ;;  %s1651_s23 = smov 64   ;;  %s19_s22 = int_to_ptr.vmem [resolvable:$true] %s18_s22 }
   0x3   :  { %s1652_s24 = smov 4  }
   0x4   :  { %24 = dma.hbm_to_vmem [thread:$0]  %s17_s20, 3072, %s19_s22, [#allocation3], %s1651_s23, %s1651_s23, %s1652_s24  }
   0x5   :  { %1646 = dma.done.wait [#allocation3], 3072  }
   0x6   :  { %1647 = vsyncadd [#allocation3], 4294964224  ;;  %v1529_v0 = vld [vmem:[%s2214_s1 + $0x38] sm:$0xff]  ;;  %v1528_v1 = vld [vmem:[%s2214_s1 + $0x30] sm:$0xff]  ;;  %vm532_vm0 = vcmask 261120   ;;  %s1301_s30 = sshll.u32 %s2218_s5, 4  ;;  %s1302_s30 = int_to_ptr.hbm [resolvable:$true] %s1301_s30 }
   0x7   :  { %294 = vmatpush.bf16.msra.mxu0 %v1529_v0  ;;  %1536 = vmatpush.bf16.msra.mxu1 %v1529_v0  ;;  %v1527_v2 = vld [vmem:[%s2214_s1 + $0x28] sm:$0xff]  ;;  %v1526_v3 = vld [vmem:[%s2214_s1 + $0x20] sm:$0xff]  ;;  %v1525_v4 = vld [vmem:[%s2214_s1 + $0x18] sm:$0xff]  ;;  %s1654_s6 = smov 128   ;;  %s1655_s7 = smov 8  }
   0x8   :  { %1537 = vmatpush.bf16.msra.mxu3 %v1529_v0  ;;  %v1524_v5 = vld [vmem:[%s2214_s1 + $0x10] sm:$0xff]  ;;  %v1523_v6 = vld [vmem:[%s2214_s1 + $0x8] sm:$0xff]  ;;  %v1522_v7 = vld [vmem:[%s2214_s1] sm:$0xff] }
   0x9   :  { %v1498_v8 = vld [vmem:[#allocation2] sm:$0xff]  ;;  %v1499_v9 = vld [vmem:[#allocation2 + $0x8] sm:$0xff]  ;;  %v1500_v10 = vld [vmem:[#allocation2 + $0x10] sm:$0xff] }
   0xa   :  { %v1501_v11 = vld [vmem:[#allocation2 + $0x18] sm:$0xff]  ;;  %v1510_v12 = vld [vmem:[#allocation2 + $0x60] sm:$0xff]  ;;  %v1511_v14 = vld [vmem:[#allocation2 + $0x68] sm:$0xff] }
   0xb   :  { %295 = vmatpush.bf16.msra.mxu0 %v1528_v1  ;;  %1538 = vmatpush.bf16.msra.mxu1 %v1528_v1  ;;  %v1502_v13 = vld [vmem:[#allocation2 + $0x20] sm:$0xff]  ;;  %v1503_v15 = vld [vmem:[#allocation2 + $0x28] sm:$0xff]  ;;  %v1512_v16 = vld [vmem:[#allocation2 + $0x70] sm:$0xff] }
   0xc   :  { %1539 = vmatpush.bf16.msra.mxu3 %v1528_v1  ;;  %v1504_v17 = vld [vmem:[#allocation2 + $0x30] sm:$0xff]  ;;  %v1513_v18 = vld [vmem:[#allocation2 + $0x78] sm:$0xff]  ;;  %v1514_v20 = vld [vmem:[#allocation2 + $0x80] sm:$0xff] }
   0xd   :  { %v1505_v19 = vld [vmem:[#allocation2 + $0x38] sm:$0xff]  ;;  %v1506_v21 = vld [vmem:[#allocation2 + $0x40] sm:$0xff]  ;;  %v1515_v29 = vld [vmem:[#allocation2 + $0x88] sm:$0xff] }
   0xe   :  { %v1507_v30 = vld [vmem:[#allocation2 + $0x48] sm:$0xff]  ;;  %v1516_v38 = vld [vmem:[#allocation2 + $0x90] sm:$0xff]  ;;  %v1517_v47 = vld [vmem:[#allocation2 + $0x98] sm:$0xff] }
   0xf   :  { %296 = vmatpush.bf16.msra.mxu0 %v1527_v2  ;;  %1540 = vmatpush.bf16.msra.mxu1 %v1527_v2  ;;  %v1508_v39 = vld [vmem:[#allocation2 + $0x50] sm:$0xff]  ;;  %v1509_v48 = vld [vmem:[#allocation2 + $0x58] sm:$0xff]  ;;  %v1518_v57 = vld [vmem:[#allocation2 + $0xa0] sm:$0xff] }
  0x10   :  { %1541 = vmatpush.bf16.msra.mxu3 %v1527_v2 }
  0x13   :  { %297 = vmatpush.bf16.msra.mxu0 %v1526_v3  ;;  %1542 = vmatpush.bf16.msra.mxu1 %v1526_v3 }
  0x14   :  { %1543 = vmatpush.bf16.msra.mxu3 %v1526_v3 }
  0x17   :  { %298 = vmatpush.bf16.msra.mxu0 %v1525_v4  ;;  %1544 = vmatpush.bf16.msra.mxu1 %v1525_v4 }
  0x18   :  { %1545 = vmatpush.bf16.msra.mxu3 %v1525_v4 }
  0x1b   :  { %299 = vmatpush.bf16.msra.mxu0 %v1524_v5  ;;  %1546 = vmatpush.bf16.msra.mxu1 %v1524_v5 }
  0x1c   :  { %1547 = vmatpush.bf16.msra.mxu3 %v1524_v5 }
  0x1f   :  { %300 = vmatpush.bf16.msra.mxu0 %v1523_v6  ;;  %1548 = vmatpush.bf16.msra.mxu1 %v1523_v6 }
  0x20   :  { %1549 = vmatpush.bf16.msra.mxu3 %v1523_v6 }
  0x23   :  { %301 = vmatpush.bf16.msra.mxu0 %v1522_v7  ;;  %1550 = vmatpush.bf16.msra.mxu1 %v1522_v7 }
  0x24   :  { %1551 = vmatpush.bf16.msra.mxu3 %v1522_v7 }
  0x26   :  { %302 = vmatmul.bf16.vlgmr.msra.gmra.mxu0 %v1498_v8  ;;  %362 = vmatmul.bf16.vlgmr.msra.gmra.mxu1 %v1510_v12  ;;  %v1519_v8 = vld [vmem:[#allocation2 + $0xa8] sm:$0xff] }
  0x36   :  { %307 = vmatmul.bf16.gmra.mxu0 %v1499_v9  ;;  %367 = vmatmul.bf16.gmra.mxu1 %v1511_v14 }
  0x46   :  { %312 = vmatmul.bf16.gmra.mxu0 %v1500_v10  ;;  %372 = vmatmul.bf16.gmra.mxu1 %v1512_v16 }
  0x56   :  { %317 = vmatmul.bf16.gmra.mxu0 %v1501_v11  ;;  %377 = vmatmul.bf16.gmra.mxu1 %v1513_v18 }
  0x66   :  { %322 = vmatmul.bf16.gmra.mxu0 %v1502_v13  ;;  %382 = vmatmul.bf16.gmra.mxu1 %v1514_v20 }
  0x76   :  { %327 = vmatmul.bf16.gmra.mxu0 %v1503_v15  ;;  %387 = vmatmul.bf16.gmra.mxu1 %v1515_v29  ;;  %v1533_v29 = vld [vmem:[%s2215_s2 + $0x18] sm:$0xff] }
  0x77   :  { %563 = vmatpush.bf16.msrb.mxu1 %v1533_v29  ;;  %1552 = vmatpush.bf16.msra.mxu2 %v1533_v29 }
  0x78   :  { %1553 = vmatpush.bf16.msrb.mxu3 %v1533_v29 }
  0x86   :  { %332 = vmatmul.bf16.gmra.mxu0 %v1504_v17  ;;  %392 = vmatmul.bf16.gmra.mxu1 %v1516_v38 }
  0x96   :  { %337 = vmatmul.bf16.gmra.mxu0 %v1505_v19  ;;  %397 = vmatmul.bf16.gmra.mxu1 %v1517_v47 }
  0xa3   :  { %v303_v22 = vpop.f32.mrf.mxu0  ;;  %v363_v55 = vpop.f32.mrf.mxu1 }
  0xa4   :  { %v423_v23 = vpack.c.bf16 %v303_v22, %v303_v22  ;;  %v447_v59 = vpack.c.bf16 %v363_v55, %v363_v55 }
  0xa6   :  { %342 = vmatmul.bf16.gmra.mxu0 %v1506_v21  ;;  %v1713_v26 = vunpack.c.l.b16 %v423_v23  ;;  %402 = vmatmul.bf16.gmra.mxu1 %v1518_v57  ;;  %v1737_v61 = vunpack.c.l.b16 %v447_v59  ;;  %v1520_v23 = vld [vmem:[#allocation2 + $0xb0] sm:$0xff]  ;;  %v1521_v57 = vld [vmem:[#allocation2 + $0xb8] sm:$0xff] }
  0xa7   :  { %417 = vmatmul.bf16.vlgmr.msra.gmra.mxu3 %v1521_v57 }
  0xab   :  { %v305_v24 = vpop.f32.mrf.mxu0  ;;  %v365_v60 = vpop.f32.mrf.mxu1 }
  0xac   :  { %v424_v25 = vpack.c.bf16 %v305_v24, %v305_v24  ;;  %v448_v62 = vpack.c.bf16 %v365_v60, %v365_v60 }
  0xae   :  { %v1715_v27 = vunpack.c.l.b16 %v424_v25  ;;  %v1739_v0 = vunpack.c.l.b16 %v448_v62 }
  0xb0   :  { %v638_v28 = vpack.c.b16 %v1715_v27, %v1713_v26  ;;  %v516_v3 = vpack.c.b16 %v1739_v0, %v1737_v61 }
  0xb3   :  { %v308_v31 = vpop.f32.mrf.mxu0  ;;  %v368_v6 = vpop.f32.mrf.mxu1 }
  0xb4   :  { %v425_v32 = vpack.c.bf16 %v308_v31, %v308_v31  ;;  %v449_v10 = vpack.c.bf16 %v368_v6, %v368_v6 }
  0xb6   :  { %347 = vmatmul.bf16.gmra.mxu0 %v1507_v30  ;;  %v1719_v35 = vunpack.c.l.b16 %v425_v32  ;;  %407 = vmatmul.bf16.gmra.mxu1 %v1519_v8  ;;  %v1749_v12 = vunpack.c.l.b16 %v449_v10 }
  0xbb   :  { %v310_v33 = vpop.f32.mrf.mxu0  ;;  %v370_v11 = vpop.f32.mrf.mxu1 }
  0xbc   :  { %v426_v34 = vpack.c.bf16 %v310_v33, %v310_v33  ;;  %v450_v13 = vpack.c.bf16 %v370_v11, %v370_v11  ;;  %v1532_v33 = vld [vmem:[%s2215_s2 + $0x10] sm:$0xff] }
  0xbd   :  { %564 = vmatpush.bf16.msrb.mxu1 %v1532_v33  ;;  %1554 = vmatpush.bf16.msra.mxu2 %v1532_v33 }
  0xbe   :  { %v1721_v36 = vunpack.c.l.b16 %v426_v34  ;;  %v1751_v15 = vunpack.c.l.b16 %v450_v13  ;;  %1555 = vmatpush.bf16.msrb.mxu3 %v1532_v33 }
  0xc0   :  { %v639_v37 = vpack.c.b16 %v1721_v36, %v1719_v35  ;;  %v517_v18 = vpack.c.b16 %v1751_v15, %v1749_v12 }
  0xc3   :  { %v313_v40 = vpop.f32.mrf.mxu0  ;;  %v373_v21 = vpop.f32.mrf.mxu1 }
  0xc4   :  { %v427_v41 = vpack.c.bf16 %v313_v40, %v313_v40  ;;  %v451_v59 = vpack.c.bf16 %v373_v21, %v373_v21 }
  0xc6   :  { %352 = vmatmul.bf16.gmra.mxu0 %v1508_v39  ;;  %v1725_v44 = vunpack.c.l.b16 %v427_v41  ;;  %412 = vmatmul.bf16.gmra.mxu1 %v1520_v23 }
  0xcb   :  { %v315_v42 = vpop.f32.mrf.mxu0  ;;  %v375_v25 = vpop.f32.mrf.mxu1 }
  0xcc   :  { %v428_v43 = vpack.c.bf16 %v315_v42, %v315_v42  ;;  %v452_v62 = vpack.c.bf16 %v375_v25, %v375_v25 }
  0xce   :  { %v1727_v45 = vunpack.c.l.b16 %v428_v43  ;;  %v509_v8 = vunpack.c.l.b16 %v452_v62 }
  0xd0   :  { %v640_v46 = vpack.c.b16 %v1727_v45, %v1725_v44 }
  0xd3   :  { %v318_v49 = vpop.f32.mrf.mxu0  ;;  %v378_v41 = vpop.f32.mrf.mxu1 }
  0xd4   :  { %v429_v50 = vpack.c.bf16 %v318_v49, %v318_v49 }
  0xd6   :  { %357 = vmatmul.bf16.gmra.mxu0 %v1509_v48  ;;  %v1731_v53 = vunpack.c.l.b16 %v429_v50 }
  0xdb   :  { %v320_v51 = vpop.f32.mrf.mxu0  ;;  %v380_v48 = vpop.f32.mrf.mxu1 }
  0xdc   :  { %v430_v52 = vpack.c.bf16 %v320_v51, %v320_v51  ;;  %v454_v21 = vpack.c.bf16 %v380_v48, %v380_v48 }
  0xde   :  { %v1733_v54 = vunpack.c.l.b16 %v430_v52  ;;  %v1531_v52 = vld [vmem:[%s2215_s2 + $0x8] sm:$0xff] }
  0xdf   :  { %688 = vmatpush.bf16.msrb.mxu2 %v1531_v52 }
  0xe0   :  { %v641_v56 = vpack.c.b16 %v1733_v54, %v1731_v53 }
  0xe3   :  { %v323_v58 = vpop.f32.mrf.mxu0 }
  0xe4   :  { %v431_v63 = vpack.c.bf16 %v323_v58, %v323_v58  ;;  %v383_v58 = vpop.f32.mrf.mxu1 }
  0xe5   :  { %v455_v48 = vpack.c.bf16 %v383_v58, %v383_v58 }
  0xe6   :  { %v1743_v4 = vunpack.c.l.b16 %v431_v63 }
  0xeb   :  { %v325_v1 = vpop.f32.mrf.mxu0 }
  0xec   :  { %v432_v2 = vpack.c.bf16 %v325_v1, %v325_v1  ;;  %v385_v11 = vpop.f32.mrf.mxu1 }
  0xee   :  { %v1745_v5 = vunpack.c.l.b16 %v432_v2  ;;  %v508_v2 = vunpack.c.l.b16 %v451_v59 }
  0xf0   :  { %v642_v7 = vpack.c.b16 %v1745_v5, %v1743_v4  ;;  %v518_v13 = vpack.c.b16 %v509_v8, %v508_v2  ;;  %v1534_v8 = vld [vmem:[%s2215_s2 + $0x20] sm:$0xff] }
  0xf2   :  { %1460 = vmatmul.msk.bf16.vlgmr.msrb.gmra.mxu3 %vm532_vm0, %v518_v13 }
  0xf3   :  { %v328_v9 = vpop.f32.mrf.mxu0 }
  0xf4   :  { %v433_v14 = vpack.c.bf16 %v328_v9, %v328_v9 }
  0xf6   :  { %v1755_v19 = vunpack.c.l.b16 %v433_v14 }
  0xfb   :  { %v330_v16 = vpop.f32.mrf.mxu0 }
  0xfc   :  { %v434_v17 = vpack.c.bf16 %v330_v16, %v330_v16  ;;  %v453_v16 = vpack.c.bf16 %v378_v41, %v378_v41  ;;  %v1535_v41 = vld [vmem:[%s2215_s2 + $0x28] sm:$0xff] }
  0xfd   :  { %818 = vmatpush.bf16.msra.mxu3 %v1535_v41 }
  0xfe   :  { %v1757_v20 = vunpack.c.l.b16 %v434_v17  ;;  %v510_v29 = vunpack.c.l.b16 %v453_v16 }
 0x100   :  { %v643_v22 = vpack.c.b16 %v1757_v20, %v1755_v19 }
 0x101   :  { %819 = vmatpush.bf16.msra.mxu3 %v1534_v8 }
 0x103   :  { %v333_v24 = vpop.f32.mrf.mxu0 }
 0x104   :  { %v435_v30 = vpack.c.bf16 %v333_v24, %v333_v24  ;;  %v388_v24 = vpop.f32.mrf.mxu1 }
 0x106   :  { %v1767_v34 = vunpack.c.l.b16 %v435_v30 }
 0x10b   :  { %v335_v31 = vpop.f32.mrf.mxu0 }
 0x10c   :  { %v436_v32 = vpack.c.bf16 %v335_v31, %v335_v31  ;;  %v511_v31 = vunpack.c.l.b16 %v454_v21 }
 0x10e   :  { %v1769_v38 = vunpack.c.l.b16 %v436_v32 }
 0x110   :  { %v644_v39 = vpack.c.b16 %v1769_v38, %v1767_v34 }
 0x113   :  { %v338_v40 = vpop.f32.mrf.mxu0 }
 0x114   :  { %v437_v42 = vpack.c.bf16 %v338_v40, %v338_v40  ;;  %v519_v40 = vpack.c.b16 %v511_v31, %v510_v29 }
 0x116   :  { %v1773_v49 = vunpack.c.l.b16 %v437_v42  ;;  %v1530_v42 = vld [vmem:[%s2215_s2] sm:$0xff]  ;;  %1461 = vmatmul.msk.bf16.gmra.mxu3 %vm532_vm0, %v519_v40 }
 0x117   :  { %689 = vmatpush.bf16.msrb.mxu2 %v1530_v42 }
 0x11b   :  { %v340_v43 = vpop.f32.mrf.mxu0 }
 0x11c   :  { %v438_v47 = vpack.c.bf16 %v340_v43, %v340_v43 }
 0x11e   :  { %v1775_v50 = vunpack.c.l.b16 %v438_v47  ;;  %v390_v47 = vpop.f32.mrf.mxu1 }
 0x120   :  { %v645_v51 = vpack.c.b16 %v1775_v50, %v1773_v49 }
 0x123   :  { %v343_v55 = vpop.f32.mrf.mxu0 }
 0x124   :  { %v439_v60 = vpack.c.bf16 %v343_v55, %v343_v55  ;;  %v456_v55 = vpack.c.bf16 %v385_v11, %v385_v11  ;;  %v457_v11 = vpack.c.bf16 %v388_v24, %v388_v24 }
 0x126   :  { %v496_v6 = vunpack.c.l.b16 %v439_v60  ;;  %v752_v60 = vunpack.c.l.b16 %v455_v48  ;;  %v393_v2 = vpop.f32.mrf.mxu1  ;;  %v754_v21 = vunpack.c.l.b16 %v457_v11 }
 0x12a   :  { %v418_v11 = vpop.f32.mrf.mxu3 }
 0x12b   :  { %v345_v63 = vpop.f32.mrf.mxu0  ;;  %v469_v35 = vpack.c.bf16 %v418_v11, %v418_v11 }
 0x12c   :  { %v440_v1 = vpack.c.bf16 %v345_v63, %v345_v63  ;;  %v753_v63 = vunpack.c.l.b16 %v456_v55 }
 0x12e   :  { %v497_v9 = vunpack.c.l.b16 %v440_v1  ;;  %v395_v58 = vpop.f32.mrf.mxu1 }
 0x12f   :  { %v460_v40 = vpack.c.bf16 %v395_v58, %v395_v58 }
 0x130   :  { %v512_v10 = vpack.c.b16 %v497_v9, %v496_v6  ;;  %v768_v9 = vpack.c.b16 %v753_v63, %v752_v60 }
 0x131   :  { %v757_v24 = vunpack.c.l.b16 %v460_v40 }
 0x132   :  { %1454 = vmatmul.msk.bf16.vlgmr.msrb.gmra.mxu1 %vm532_vm0, %v512_v10  ;;  %1490 = vmatmul.msk.bf16.vlgmr.msra.gmra.mxu3 %vm532_vm0, %v768_v9 }
 0x133   :  { %v348_v14 = vpop.f32.mrf.mxu0 }
 0x134   :  { %v441_v17 = vpack.c.bf16 %v348_v14, %v348_v14  ;;  %v458_v14 = vpack.c.bf16 %v390_v47, %v390_v47 }
 0x136   :  { %v498_v30 = vunpack.c.l.b16 %v441_v17 }
 0x13b   :  { %v350_v23 = vpop.f32.mrf.mxu0 }
 0x13c   :  { %v442_v25 = vpack.c.bf16 %v350_v23, %v350_v23 }
 0x13e   :  { %v499_v32 = vunpack.c.l.b16 %v442_v25  ;;  %v755_v25 = vunpack.c.l.b16 %v458_v14  ;;  %v420_v14 = vpop.f32.mrf.mxu3 }
 0x13f   :  { %v470_v36 = vpack.c.bf16 %v420_v14, %v420_v14 }
 0x140   :  { %v513_v33 = vpack.c.b16 %v499_v32, %v498_v30  ;;  %v769_v31 = vpack.c.b16 %v755_v25, %v754_v21  ;;  %v398_v32 = vpop.f32.mrf.mxu1 }
 0x141   :  { %v461_v48 = vpack.c.bf16 %v398_v32, %v398_v32 }
 0x142   :  { %1455 = vmatmul.msk.bf16.vlgmr.msra.gmra.mxu2 %vm532_vm0, %v513_v33  ;;  %1491 = vmatmul.msk.bf16.gmra.mxu3 %vm532_vm0, %v769_v31  ;;  %v459_v33 = vpack.c.bf16 %v393_v2, %v393_v2 }
 0x143   :  { %v353_v43 = vpop.f32.mrf.mxu0  ;;  %v758_v55 = vunpack.c.l.b16 %v461_v48 }
 0x144   :  { %v443_v52 = vpack.c.bf16 %v353_v43, %v353_v43  ;;  %v756_v41 = vunpack.c.l.b16 %v459_v33 }
 0x146   :  { %v500_v62 = vunpack.c.l.b16 %v443_v52  ;;  %v770_v43 = vpack.c.b16 %v757_v24, %v756_v41 }
 0x148   :  { %v400_v42 = vpop.f32.mrf.mxu1 }
 0x149   :  { %v462_v52 = vpack.c.bf16 %v400_v42, %v400_v42 }
 0x14b   :  { %v355_v57 = vpop.f32.mrf.mxu0 }
 0x14c   :  { %v444_v59 = vpack.c.bf16 %v355_v57, %v355_v57  ;;  %v759_v57 = vunpack.c.l.b16 %v462_v52 }
 0x14e   :  { %v501_v1 = vunpack.c.l.b16 %v444_v59  ;;  %v771_v60 = vpack.c.b16 %v759_v57, %v758_v55 }
 0x150   :  { %v514_v6 = vpack.c.b16 %v501_v1, %v500_v62  ;;  %v403_v47 = vpop.f32.mrf.mxu1 }
 0x151   :  { %v463_v62 = vpack.c.bf16 %v403_v47, %v403_v47 }
 0x152   :  { %1456 = vmatmul.msk.bf16.gmra.mxu2 %vm532_vm0, %v514_v6  ;;  %1492 = vmatmul.msk.bf16.gmra.mxu3 %vm532_vm0, %v770_v43 }
 0x153   :  { %v358_v10 = vpop.f32.mrf.mxu0 }
 0x154   :  { %v445_v13 = vpack.c.bf16 %v358_v10, %v358_v10 }
 0x156   :  { %v502_v23 = vunpack.c.l.b16 %v445_v13 }
 0x158   :  { %v405_v59 = vpop.f32.mrf.mxu1 }
 0x159   :  { %v464_v61 = vpack.c.bf16 %v405_v59, %v405_v59 }
 0x15b   :  { %v360_v16 = vpop.f32.mrf.mxu0  ;;  %v761_v63 = vunpack.c.l.b16 %v464_v61 }
 0x15c   :  { %v446_v17 = vpack.c.bf16 %v360_v16, %v360_v16  ;;  %v767_v16 = vunpack.c.l.b16 %v470_v36 }
 0x15e   :  { %v503_v29 = vunpack.c.l.b16 %v446_v17 }
 0x160   :  { %v515_v30 = vpack.c.b16 %v503_v29, %v502_v23  ;;  %v408_v0 = vpop.f32.mrf.mxu1 }
 0x161   :  { %v465_v6 = vpack.c.bf16 %v408_v0, %v408_v0 }
 0x162   :  { %1457 = vmatmul.msk.bf16.gmra.mxu2 %vm532_vm0, %v515_v30  ;;  %1493 = vmatmul.msk.bf16.gmra.mxu3 %vm532_vm0, %v771_v60 }
 0x163   :  { %v762_v15 = vunpack.c.l.b16 %v465_v6 }
 0x168   :  { %v410_v2 = vpop.f32.mrf.mxu1 }
 0x169   :  { %v466_v12 = vpack.c.bf16 %v410_v2, %v410_v2 }
 0x170   :  { %v413_v8 = vpop.f32.mrf.mxu1 }
 0x171   :  { %v467_v26 = vpack.c.bf16 %v413_v8, %v413_v8 }
 0x172   :  { %1458 = vmatmul.msk.bf16.gmra.mxu2 %vm532_vm0, %v516_v3  ;;  %v760_v3 = vunpack.c.l.b16 %v463_v62 }
 0x174   :  { %v772_v1 = vpack.c.b16 %v761_v63, %v760_v3 }
 0x175   :  { %v1829_v44 = vpop.f32.mrf.mxu3 }
 0x176   :  { %1494 = vmatmul.msk.bf16.gmra.mxu3 %vm532_vm0, %v772_v1 }
 0x178   :  { %v415_v10 = vpop.f32.mrf.mxu1 }
 0x179   :  { %v468_v27 = vpack.c.bf16 %v415_v10, %v415_v10 }
 0x17b   :  { %v765_v58 = vunpack.c.l.b16 %v468_v27 }
 0x182   :  { %1459 = vmatmul.msk.bf16.gmra.mxu2 %vm532_vm0, %v517_v18  ;;  %v763_v18 = vunpack.c.l.b16 %v466_v12 }
 0x184   :  { %v773_v9 = vpack.c.b16 %v763_v18, %v762_v15 }
 0x186   :  { %1495 = vmatmul.msk.bf16.gmra.mxu3 %vm532_vm0, %v773_v9 }
 0x192   :  { %1470 = vmatmul.msk.bf16.vlgmr.msrb.gmra.mxu2 %vm532_vm0, %v638_v28  ;;  %v764_v28 = vunpack.c.l.b16 %v467_v26 }
 0x194   :  { %v774_v13 = vpack.c.b16 %v765_v58, %v764_v28 }
 0x196   :  { %1496 = vmatmul.msk.bf16.gmra.mxu3 %vm532_vm0, %v774_v13 }
 0x1a2   :  { %1471 = vmatmul.msk.bf16.gmra.mxu2 %vm532_vm0, %v639_v37  ;;  %v766_v37 = vunpack.c.l.b16 %v469_v35 }
 0x1a4   :  { %v775_v17 = vpack.c.b16 %v767_v16, %v766_v37 }
 0x1a6   :  { %1497 = vmatmul.msk.bf16.gmra.mxu3 %vm532_vm0, %v775_v17 }
 0x1af   :  { %v566_v31 = vpop.f32.mrf.mxu1 }
 0x1b2   :  { %1472 = vmatmul.msk.bf16.gmra.mxu2 %vm532_vm0, %v640_v46  ;;  %v1835_v46 = vpop.f32.mrf.mxu3 }
 0x1ba   :  { %v1841_v54 = vpop.f32.mrf.mxu3 }
 0x1c2   :  { %1473 = vmatmul.msk.bf16.gmra.mxu2 %vm532_vm0, %v641_v56  ;;  %v1843_v29 = vpop.f32.mrf.mxu3 }
 0x1c5   :  { %v571_v21 = vpop.f32.mrf.mxu2 }
 0x1ca   :  { %v821_v5 = vpop.f32.mrf.mxu3 }
 0x1cd   :  { %v573_v23 = vpop.f32.mrf.mxu2 }
 0x1d2   :  { %1474 = vmatmul.msk.bf16.gmra.mxu2 %vm532_vm0, %v642_v7  ;;  %v823_v19 = vpop.f32.mrf.mxu3 }
 0x1d5   :  { %v576_v45 = vpop.f32.mrf.mxu2 }
 0x1dd   :  { %v578_v25 = vpop.f32.mrf.mxu2 }
 0x1e2   :  { %1475 = vmatmul.msk.bf16.gmra.mxu2 %vm532_vm0, %v643_v22  ;;  %v826_v22 = vpop.f32.mrf.mxu3 }
 0x1e5   :  { %v581_v53 = vpop.f32.mrf.mxu2 }
 0x1ea   :  { %v828_v34 = vpop.f32.mrf.mxu3 }
 0x1ed   :  { %v583_v56 = vpop.f32.mrf.mxu2 }
 0x1f2   :  { %1476 = vmatmul.msk.bf16.gmra.mxu2 %vm532_vm0, %v644_v39  ;;  %v568_v39 = vpop.f32.mrf.mxu1  ;;  %v831_v49 = vpop.f32.mrf.mxu3 }
 0x1f5   :  { %v586_v4 = vpop.f32.mrf.mxu2 }
 0x1fa   :  { %v833_v43 = vpop.f32.mrf.mxu3 }
 0x1fd   :  { %v588_v7 = vpop.f32.mrf.mxu2 }
 0x202   :  { %1477 = vmatmul.msk.bf16.gmra.mxu2 %vm532_vm0, %v645_v51  ;;  %v836_v55 = vpop.f32.mrf.mxu3 }
 0x205   :  { %v1853_v20 = vpop.f32.mrf.mxu2 }
 0x20a   :  { %v838_v61 = vpop.f32.mrf.mxu3 }
 0x20d   :  { %v1855_v30 = vpop.f32.mrf.mxu2 }
 0x212   :  { %v841_v3 = vpop.f32.mrf.mxu3 }
 0x215   :  { %v691_v32 = vpop.f32.mrf.mxu2 }
 0x216   :  { %v692_v33 = vadd.f32 %v691_v32, %v566_v31 }
 0x218   :  { %v1857_v38 = vadd.f32 %v821_v5, %v692_v33 }
 0x21a   :  { %v843_v1 = vpop.f32.mrf.mxu3  ;;  %v898_v27 = vmul.f32 %v1857_v38, %v1857_v38 }
 0x21d   :  { %v693_v40 = vpop.f32.mrf.mxu2 }
 0x21e   :  { %v694_v42 = vadd.f32 %v693_v40, %v568_v39 }
 0x220   :  { %v1859_v41 = vadd.f32 %v823_v19, %v694_v42 }
 0x222   :  { %v846_v6 = vpop.f32.mrf.mxu3  ;;  %v899_v10 = vmul.f32 %v1859_v41, %v1859_v41  ;;  %v877_v13 = vadd.f32 %v1859_v41, %v1857_v38 }
 0x224   :  { %v914_v14 = vadd.f32 %v899_v10, %v898_v27 }
 0x225   :  { %v696_v50 = vpop.f32.mrf.mxu2 }
 0x226   :  { %v697_v51 = vadd.f32 %v696_v50, %v571_v21 }
 0x228   :  { %v1861_v24 = vadd.f32 %v826_v22, %v697_v51 }
 0x22a   :  { %v848_v18 = vpop.f32.mrf.mxu3  ;;  %v900_v28 = vmul.f32 %v1861_v24, %v1861_v24  ;;  %v878_v16 = vadd.f32 %v877_v13, %v1861_v24 }
 0x22c   :  { %v915_v17 = vadd.f32 %v914_v14, %v900_v28 }
 0x22d   :  { %v698_v47 = vpop.f32.mrf.mxu2 }
 0x22e   :  { %v699_v48 = vadd.f32 %v698_v47, %v573_v23 }
 0x230   :  { %v1863_v52 = vadd.f32 %v828_v34, %v699_v48 }
 0x232   :  { %v851_v9 = vpop.f32.mrf.mxu3  ;;  %v901_v35 = vmul.f32 %v1863_v52, %v1863_v52 }
 0x235   :  { %v701_v57 = vpop.f32.mrf.mxu2 }
 0x236   :  { %v702_v59 = vadd.f32 %v701_v57, %v576_v45 }
 0x238   :  { %v1865_v60 = vadd.f32 %v831_v49, %v702_v59 }
 0x23a   :  { %v902_v21 = vmul.f32 %v1865_v60, %v1865_v60  ;;  %v853_v22 = vpop.f32.mrf.mxu3 }
 0x23d   :  { %v703_v62 = vpop.f32.mrf.mxu2 }
 0x23e   :  { %v704_v26 = vadd.f32 %v703_v62, %v578_v25  ;;  %v879_v25 = vadd.f32 %v878_v16, %v1863_v52 }
 0x240   :  { %v1877_v36 = vadd.f32 %v833_v43, %v704_v26 }
 0x242   :  { %v903_v5 = vmul.f32 %v1877_v36, %v1877_v36 }
 0x245   :  { %v706_v0 = vpop.f32.mrf.mxu2 }
 0x246   :  { %v707_v58 = vadd.f32 %v706_v0, %v581_v53  ;;  %v916_v53 = vadd.f32 %v915_v17, %v901_v35 }
 0x248   :  { %v1882_v23 = vadd.f32 %v836_v55, %v707_v58  ;;  %v917_v32 = vadd.f32 %v916_v53, %v902_v21 }
 0x24a   :  { %v904_v33 = vmul.f32 %v1882_v23, %v1882_v23  ;;  %v918_v42 = vadd.f32 %v917_v32, %v903_v5 }
 0x24c   :  { %v919_v43 = vadd.f32 %v918_v42, %v904_v33 }
 0x24d   :  { %v708_v63 = vpop.f32.mrf.mxu2 }
 0x24e   :  { %v709_v37 = vadd.f32 %v708_v63, %v583_v56  ;;  %v880_v56 = vadd.f32 %v879_v25, %v1865_v60 }
 0x250   :  { %v1887_v19 = vadd.f32 %v838_v61, %v709_v37 }
 0x252   :  { %v905_v49 = vmul.f32 %v1887_v19, %v1887_v19 }
 0x254   :  { %v920_v57 = vadd.f32 %v919_v43, %v905_v49 }
 0x255   :  { %v711_v2 = vpop.f32.mrf.mxu2 }
 0x256   :  { %v712_v45 = vadd.f32 %v711_v2, %v586_v4  ;;  %v881_v4 = vadd.f32 %v880_v56, %v1877_v36 }
 0x258   :  { %v1892_v34 = vadd.f32 %v841_v3, %v712_v45  ;;  %v882_v50 = vadd.f32 %v881_v4, %v1882_v23  ;;  %v856_v3 = vpop.f32.mrf.mxu3 }
 0x25a   :  { %v906_v47 = vmul.f32 %v1892_v34, %v1892_v34  ;;  %v883_v48 = vadd.f32 %v882_v50, %v1887_v19 }
 0x25c   :  { %v884_v59 = vadd.f32 %v883_v48, %v1892_v34  ;;  %v921_v0 = vadd.f32 %v920_v57, %v906_v47 }
 0x25d   :  { %v713_v12 = vpop.f32.mrf.mxu2 }
 0x25e   :  { %v714_v31 = vadd.f32 %v713_v12, %v588_v7 }
 0x260   :  { %v1899_v51 = vadd.f32 %v843_v1, %v714_v31  ;;  %v858_v37 = vpop.f32.mrf.mxu3 }
 0x262   :  { %v907_v62 = vmul.f32 %v1899_v51, %v1899_v51  ;;  %v885_v1 = vadd.f32 %v884_v59, %v1899_v51 }
 0x264   :  { %v922_v12 = vadd.f32 %v921_v0, %v907_v62 }
 0x265   :  { %v716_v15 = vpop.f32.mrf.mxu2 }
 0x266   :  { %v717_v40 = vadd.f32 %v716_v15, %v1853_v20 }
 0x268   :  { %v1905_v55 = vadd.f32 %v846_v6, %v717_v40 }
 0x26a   :  { %v908_v2 = vmul.f32 %v1905_v55, %v1905_v55  ;;  %v886_v15 = vadd.f32 %v885_v1, %v1905_v55 }
 0x26d   :  { %v718_v8 = vpop.f32.mrf.mxu2 }
 0x26e   :  { %v719_v7 = vadd.f32 %v718_v8, %v1855_v30 }
 0x270   :  { %v1911_v61 = vadd.f32 %v848_v18, %v719_v7 }
 0x272   :  { %v909_v18 = vmul.f32 %v1911_v61, %v1911_v61  ;;  %v887_v10 = vadd.f32 %v886_v15, %v1911_v61 }
 0x275   :  { %v721_v11 = vpop.f32.mrf.mxu2 }
 0x276   :  { %v722_v20 = vadd.f32 %v721_v11, %v1829_v44 }
 0x278   :  { %v1917_v6 = vadd.f32 %v851_v9, %v722_v20 }
 0x27a   :  { %v910_v26 = vmul.f32 %v1917_v6, %v1917_v6  ;;  %v888_v28 = vadd.f32 %v887_v10, %v1917_v6 }
 0x27d   :  { %v723_v39 = vpop.f32.mrf.mxu2 }
 0x27e   :  { %v724_v30 = vadd.f32 %v723_v39, %v1835_v46  ;;  %v923_v46 = vadd.f32 %v922_v12, %v908_v2 }
 0x280   :  { %v1923_v8 = vadd.f32 %v853_v22, %v724_v30  ;;  %v924_v9 = vadd.f32 %v923_v46, %v909_v18  ;;  %v1964_v18 = vld [vmem:[%s2216_s3] ss:$0 sm:$0xff] }
 0x282   :  { %v925_v11 = vadd.f32 %v924_v9, %v910_v26  ;;  %v889_v13 = vadd.f32 %v888_v28, %v1923_v8  ;;  %v1979_v9 = vld [vmem:[%s2217_s4] ss:$0 sm:$0xff]  ;;  %s1653_s4 = smov [#allocation5]  }
 0x283   :  { %s1299_s28 = sshll.u32 %s1653_s4, 4  ;;  %s1300_s28 = int_to_ptr.vmem [resolvable:$true] %s1299_s28 }
 0x285   :  { %v726_v63 = vpop.f32.mrf.mxu2 }
 0x286   :  { %v727_v44 = vadd.f32 %v726_v63, %v1841_v54  ;;  %v911_v54 = vmul.f32 %v1923_v8, %v1923_v8 }
 0x288   :  { %v1928_v27 = vadd.f32 %v856_v3, %v727_v44  ;;  %v926_v16 = vadd.f32 %v925_v11, %v911_v54 }
 0x28a   :  { %v912_v14 = vmul.f32 %v1928_v27, %v1928_v27  ;;  %v890_v17 = vadd.f32 %v889_v13, %v1928_v27 }
 0x28c   :  { %v927_v45 = vadd.f32 %v926_v16, %v912_v14 }
 0x28d   :  { %v728_v58 = vpop.f32.mrf.mxu2 }
 0x28e   :  { %v729_v35 = vadd.f32 %v728_v58, %v1843_v29 }
 0x290   :  { %v1938_v21 = vadd.f32 %v858_v37, %v729_v35 }
 0x292   :  { %v891_v25 = vadd.f32 %v890_v17, %v1938_v21  ;;  %v913_v53 = vmul.f32 %v1938_v21, %v1938_v21 }
 0x294   :  { %v892_v5 = vrot.slane %v891_v25, 4  ;;  %v928_v22 = vadd.f32 %v927_v45, %v913_v53 }
 0x296   :  { %v893_v56 = vadd.f32 %v892_v5, %v891_v25  ;;  %v929_v31 = vrot.slane %v928_v22, 4 }
 0x298   :  { %v894_v32 = vrot.slane %v893_v56, 2  ;;  %v930_v33 = vadd.f32 %v929_v31, %v928_v22 }
 0x29a   :  { %v895_v39 = vadd.f32 %v894_v32, %v893_v56  ;;  %v931_v29 = vrot.slane %v930_v33, 2 }
 0x29c   :  { %v896_v4 = vrot.slane %v895_v39, 1  ;;  %v932_v40 = vadd.f32 %v931_v29, %v930_v33 }
 0x29e   :  { %v897_v42 = vadd.f32 %v896_v4, %v895_v39  ;;  %v933_v49 = vrot.slane %v932_v40, 1 }
 0x2a0   :  { %v934_v50 = vadd.f32 %v933_v49, %v932_v40  ;;  %v1943_v7 = vmul.f32 0.0078125, %v897_v42 }
 0x2a2   :  { %v936_v43 = vmul.f32 0.0078125, %v934_v50  ;;  %v937_v47 = vmul.f32 %v1943_v7, %v1943_v7  ;;  %v955_v48 = vsub.f32 %v1938_v21, %v1943_v7  ;;  %v951_v57 = vsub.f32 %v1911_v61, %v1943_v7 }
 0x2a3   :  { %v950_v59 = vsub.f32 %v1905_v55, %v1943_v7  ;;  %v954_v30 = vsub.f32 %v1928_v27, %v1943_v7  ;;  %v953_v0 = vsub.f32 %v1923_v8, %v1943_v7  ;;  %v952_v3 = vsub.f32 %v1917_v6, %v1943_v7 }
 0x2a4   :  { %v938_v20 = vsub.f32 %v936_v43, %v937_v47  ;;  %v944_v55 = vsub.f32 %v1865_v60, %v1943_v7  ;;  %v942_v6 = vsub.f32 %v1861_v24, %v1943_v7  ;;  %v940_v8 = vsub.f32 %v1857_v38, %v1943_v7 }
 0x2a5   :  { %v945_v46 = vsub.f32 %v1877_v36, %v1943_v7  ;;  %v943_v26 = vsub.f32 %v1863_v52, %v1943_v7  ;;  %v941_v60 = vsub.f32 %v1859_v41, %v1943_v7  ;;  %v948_v17 = vsub.f32 %v1892_v34, %v1943_v7 }
 0x2a6   :  { %v939_v62 = vmax.f32 %v938_v20, 0.0  ;;  %v947_v45 = vsub.f32 %v1887_v19, %v1943_v7  ;;  %v946_v32 = vsub.f32 %v1882_v23, %v1943_v7 }
 0x2a8   :  { %v956_v63 = vadd.f32 1e-05, %v939_v62 }
 0x2aa   :  { %1564 = vrsqrt.f32 %v956_v63  ;;  %vm963_vm2 = vweird.f32 %v956_v63 }
 0x2b0   :  { %v1565_v1 = vpop.eup %1564 }
 0x2b1   :  { %v958_v2 = vmul.f32 %v1565_v1, %v956_v63  ;;  %vm964_vm1 = vweird.f32 %v1565_v1 }
 0x2b2   :  { %vm965_vm3 = vmor %vm963_vm2, %vm964_vm1 }
 0x2b3   :  { %v959_v44 = vmul.f32 %v1565_v1, %v958_v2 }
 0x2b5   :  { %v960_v12 = vmul.f32 0.5, %v959_v44 }
 0x2b7   :  { %v961_v61 = vsub.f32 1.5, %v960_v12 }
 0x2b9   :  { %v962_v15 = vmul.f32 %v1565_v1, %v961_v61 }
 0x2bb   :  { %v966_v10 = vsel %vm965_vm3, %v1565_v1, %v962_v15 }
 0x2bc   :  { %v971_v27 = vmul.f32 %v966_v10, %v944_v55  ;;  %v969_v24 = vmul.f32 %v966_v10, %v942_v6  ;;  %v967_v28 = vmul.f32 %v966_v10, %v940_v8  ;;  %v972_v54 = vmul.f32 %v966_v10, %v945_v46 }
 0x2bd   :  { %v970_v38 = vmul.f32 %v966_v10, %v943_v26  ;;  %v968_v58 = vmul.f32 %v966_v10, %v941_v60  ;;  %v975_v56 = vmul.f32 %v966_v10, %v948_v17  ;;  %v974_v31 = vmul.f32 %v966_v10, %v947_v45 }
 0x2be   :  { %v991_v36 = vmul.f32 %v1964_v18, %v971_v27  ;;  %v989_v11 = vmul.f32 %v1964_v18, %v969_v24  ;;  %v987_v52 = vmul.f32 %v1964_v18, %v967_v28  ;;  %v992_v13 = vmul.f32 %v1964_v18, %v972_v54 }
 0x2bf   :  { %v990_v37 = vmul.f32 %v1964_v18, %v970_v38  ;;  %v988_v16 = vmul.f32 %v1964_v18, %v968_v58  ;;  %v973_v4 = vmul.f32 %v966_v10, %v946_v32  ;;  %v978_v40 = vmul.f32 %v966_v10, %v951_v57 }
 0x2c0   :  { %v1011_v41 = vadd.f32 %v1979_v9, %v991_v36  ;;  %v1009_v14 = vadd.f32 %v1979_v9, %v989_v11  ;;  %v1007_v35 = vadd.f32 %v1979_v9, %v987_v52  ;;  %v1012_v22 = vadd.f32 %v1979_v9, %v992_v13 }
 0x2c1   :  { %v1010_v39 = vadd.f32 %v1979_v9, %v990_v37  ;;  %v1008_v29 = vadd.f32 %v1979_v9, %v988_v16  ;;  %v977_v42 = vmul.f32 %v966_v10, %v950_v59  ;;  %v995_v23 = vmul.f32 %v1964_v18, %v975_v56 }
 0x2c2   :  { %v1994_v25 = vmax.f32 %v1011_v41, 0.0  ;;  %v1996_v53 = vmax.f32 %v1009_v14, 0.0  ;;  %v1998_v5 = vmax.f32 %v1007_v35, 0.0  ;;  %v981_v49 = vmul.f32 %v966_v10, %v954_v30 }
 0x2c3   :  { %v980_v50 = vmul.f32 %v966_v10, %v953_v0  ;;  %v979_v43 = vmul.f32 %v966_v10, %v952_v3  ;;  %v2012_v47 = vmax.f32 %v1012_v22, 0.0  ;;  %v2014_v20 = vmax.f32 %v1010_v39, 0.0 }
 0x2c4   :  { %v1043_v33 = vmul.f32 %v1994_v25, %v1994_v25  ;;  %v1041_v34 = vmul.f32 %v1996_v53, %v1996_v53  ;;  %v1039_v19 = vmul.f32 %v1998_v5, %v1998_v5  ;;  %v994_v62 = vmul.f32 %v1964_v18, %v974_v31 }
 0x2c5   :  { %v982_v63 = vmul.f32 %v966_v10, %v955_v48  ;;  %v2020_v1 = vmax.f32 %v1008_v29, 0.0  ;;  %v993_v57 = vmul.f32 %v1964_v18, %v973_v4  ;;  %v949_v59 = vsub.f32 %v1899_v51, %v1943_v7 }
 0x2c6   :  { %1063 = vadd.xlane.f32.xlu2 %v1043_v33  ;;  %1059 = vadd.xlane.f32.xlu1 %v1041_v34  ;;  %v1044_v30 = vmul.f32 %v2012_v47, %v2012_v47  ;;  %v1042_v0 = vmul.f32 %v2014_v20, %v2014_v20  ;;  %v1015_v3 = vadd.f32 %v1979_v9, %v995_v23 }
 0x2c7   :  { %1055 = vadd.xlane.f32.xlu0 %v1039_v19  ;;  %v1014_v2 = vadd.f32 %v1979_v9, %v994_v62  ;;  %v1040_v21 = vmul.f32 %v2020_v1, %v2020_v1  ;;  %v1013_v48 = vadd.f32 %v1979_v9, %v993_v57  ;;  %v976_v44 = vmul.f32 %v966_v10, %v949_v59 }
 0x2c8   :  { %v2034_v51 = vmax.f32 %v1015_v3, 0.0  ;;  %v998_v12 = vmul.f32 %v1964_v18, %v978_v40  ;;  %v997_v61 = vmul.f32 %v1964_v18, %v977_v42  ;;  %v1001_v28 = vmul.f32 %v1964_v18, %v981_v49 }
 0x2c9   :  { %v2036_v7 = vmax.f32 %v1014_v2, 0.0  ;;  %v2040_v15 = vmax.f32 %v1013_v48, 0.0  ;;  %v996_v55 = vmul.f32 %v1964_v18, %v976_v44  ;;  %v1000_v54 = vmul.f32 %v1964_v18, %v980_v50 }
 0x2ca   :  { %v1047_v6 = vmul.f32 %v2034_v51, %v2034_v51  ;;  %v1018_v46 = vadd.f32 %v1979_v9, %v998_v12  ;;  %v1017_v10 = vadd.f32 %v1979_v9, %v997_v61  ;;  %v999_v58 = vmul.f32 %v1964_v18, %v979_v43 }
 0x2cb   :  { %v1046_v8 = vmul.f32 %v2036_v7, %v2036_v7  ;;  %v1045_v26 = vmul.f32 %v2040_v15, %v2040_v15  ;;  %v1016_v60 = vadd.f32 %v1979_v9, %v996_v55  ;;  %v1021_v52 = vadd.f32 %v1979_v9, %v1001_v28 }
 0x2cc   :  { %v2052_v27 = vmax.f32 %v1018_v46, 0.0  ;;  %v2054_v24 = vmax.f32 %v1017_v10, 0.0  ;;  %v1020_v13 = vadd.f32 %v1979_v9, %v1000_v54  ;;  %v1019_v14 = vadd.f32 %v1979_v9, %v999_v58 }
 0x2cd   :  { %v2058_v38 = vmax.f32 %v1016_v60, 0.0  ;;  %v2070_v35 = vmax.f32 %v1021_v52, 0.0  ;;  %v1002_v17 = vmul.f32 %v1964_v18, %v982_v63 }
 0x2ce   :  { %1065 = vadd.xlane.f32.xlu2 %v1044_v30  ;;  %1061 = vadd.xlane.f32.xlu1 %v1042_v0  ;;  %v1050_v36 = vmul.f32 %v2052_v27, %v2052_v27  ;;  %v1049_v11 = vmul.f32 %v2054_v24, %v2054_v24  ;;  %v2072_v37 = vmax.f32 %v1020_v13, 0.0  ;;  %v2074_v16 = vmax.f32 %v1019_v14, 0.0 }
 0x2cf   :  { %1057 = vadd.xlane.f32.xlu0 %v1040_v21  ;;  %v1048_v41 = vmul.f32 %v2058_v38, %v2058_v38  ;;  %v1053_v45 = vmul.f32 %v2070_v35, %v2070_v35  ;;  %v1022_v31 = vadd.f32 %v1979_v9, %v1002_v17 }
 0x2d0   :  { %v1052_v22 = vmul.f32 %v2072_v37, %v2072_v37  ;;  %v1051_v56 = vmul.f32 %v2074_v16, %v2074_v16 }
 0x2d1   :  { %v2084_v32 = vmax.f32 %v1022_v31, 0.0 }
 0x2d3   :  { %v1054_v33 = vmul.f32 %v2084_v32, %v2084_v32 }
 0x2d6   :  { %1071 = vadd.xlane.f32.xlu2 %v1047_v6  ;;  %1069 = vadd.xlane.f32.xlu1 %v1046_v8 }
 0x2d7   :  { %1067 = vadd.xlane.f32.xlu0 %v1045_v26 }
 0x2de   :  { %1077 = vadd.xlane.f32.xlu2 %v1050_v36  ;;  %1075 = vadd.xlane.f32.xlu1 %v1049_v11 }
 0x2df   :  { %1073 = vadd.xlane.f32.xlu0 %v1048_v41 }
 0x2e6   :  { %1083 = vadd.xlane.f32.xlu2 %v1053_v45  ;;  %1081 = vadd.xlane.f32.xlu1 %v1052_v22 }
 0x2e7   :  { %1079 = vadd.xlane.f32.xlu0 %v1051_v56 }
 0x2ef   :  { %1085 = vadd.xlane.f32.xlu0 %v1054_v33 }
 0x339   :  { %v1064_v18 = vpop.xlane.xlu2 %1063  ;;  %v1060_v34 = vpop.xlane.xlu1 %1059 }
 0x33a   :  { %v1091_v19 = vmax.f32 %v1064_v18, 1e-24  ;;  %v1089_v39 = vmax.f32 %v1060_v34, 1e-24  ;;  %v1056_v29 = vpop.xlane.xlu0 %1055 }
 0x33b   :  { %v1087_v4 = vmax.f32 %v1056_v29, 1e-24 }
 0x33c   :  { %1566 = vrsqrt.f32 %v1091_v19  ;;  %vm1149_vm4 = vweird.f32 %v1091_v19  ;;  %vm1129_vm6 = vweird.f32 %v1089_v39 }
 0x33d   :  { %1568 = vrsqrt.f32 %v1089_v39  ;;  %vm1109_vm8 = vweird.f32 %v1087_v4 }
 0x33e   :  { %1570 = vrsqrt.f32 %v1087_v4 }
 0x341   :  { %v1066_v40 = vpop.xlane.xlu2 %1065  ;;  %v1062_v9 = vpop.xlane.xlu1 %1061 }
 0x342   :  { %v1567_v42 = vpop.eup %1566  ;;  %v2088_v23 = vmax.f32 %v1066_v40, 1e-24  ;;  %v2090_v49 = vmax.f32 %v1062_v9, 1e-24  ;;  %v1058_v50 = vpop.xlane.xlu0 %1057 }
 0x343   :  { %v1569_v43 = vpop.eup %1568  ;;  %v1144_v62 = vmul.f32 %v1567_v42, %v1091_v19  ;;  %v2092_v63 = vmax.f32 %v1058_v50, 1e-24  ;;  %vm1150_vm5 = vweird.f32 %v1567_v42 }
 0x344   :  { %v1571_v57 = vpop.eup %1570  ;;  %v1124_v59 = vmul.f32 %v1569_v43, %v1089_v39  ;;  %1572 = vrsqrt.f32 %v2088_v23  ;;  %vm1130_vm7 = vweird.f32 %v1569_v43  ;;  %vm1151_vm10 = vmor %vm1149_vm4, %vm1150_vm5  ;;  %vm1159_vm13 = vweird.f32 %v2088_v23 }
 0x345   :  { %v1145_v30 = vmul.f32 %v1567_v42, %v1144_v62  ;;  %v1104_v0 = vmul.f32 %v1571_v57, %v1087_v4  ;;  %1574 = vrsqrt.f32 %v2090_v49  ;;  %vm1110_vm9 = vweird.f32 %v1571_v57  ;;  %vm1131_vm11 = vmor %vm1129_vm6, %vm1130_vm7 }
 0x346   :  { %v1125_v3 = vmul.f32 %v1569_v43, %v1124_v59  ;;  %1576 = vrsqrt.f32 %v2092_v63  ;;  %vm1111_vm12 = vmor %vm1109_vm8, %vm1110_vm9  ;;  %vm1139_vm2 = vweird.f32 %v2090_v49  ;;  %vm1119_vm3 = vweird.f32 %v2092_v63 }
 0x347   :  { %v1146_v2 = vmul.f32 0.5, %v1145_v30  ;;  %v1105_v21 = vmul.f32 %v1571_v57, %v1104_v0 }
 0x348   :  { %v1126_v48 = vmul.f32 0.5, %v1125_v3 }
 0x349   :  { %v1147_v44 = vsub.f32 1.5, %v1146_v2  ;;  %v1106_v12 = vmul.f32 0.5, %v1105_v21  ;;  %v1072_v61 = vpop.xlane.xlu2 %1071  ;;  %v1070_v55 = vpop.xlane.xlu1 %1069 }
 0x34a   :  { %v2097_v6 = vpop.eup %1572  ;;  %v1127_v8 = vsub.f32 1.5, %v1126_v48  ;;  %v2099_v46 = vmax.f32 %v1072_v61, 1e-24  ;;  %v1068_v10 = vpop.xlane.xlu0 %1067  ;;  %v2112_v52 = vmax.f32 %v1070_v55, 1e-24 }
 0x34b   :  { %v2101_v26 = vpop.eup %1574  ;;  %v1148_v60 = vmul.f32 %v1567_v42, %v1147_v44  ;;  %v1107_v28 = vsub.f32 1.5, %v1106_v12  ;;  %v1154_v54 = vmul.f32 %v2097_v6, %v2088_v23  ;;  %vm1160_vm14 = vweird.f32 %v2097_v6 }
 0x34c   :  { %v2105_v58 = vpop.eup %1576  ;;  %v1128_v36 = vmul.f32 %v1569_v43, %v1127_v8  ;;  %v1134_v11 = vmul.f32 %v2101_v26, %v2090_v49  ;;  %1578 = vrsqrt.f32 %v2099_v46  ;;  %v2129_v4 = vmax.f32 %v1068_v10, 1e-24  ;;  %vm1161_vm1 = vmor %vm1159_vm13, %vm1160_vm14 }
 0x34d   :  { %v1152_v13 = vsel %vm1151_vm10, %v1567_v42, %v1148_v60  ;;  %v1108_v41 = vmul.f32 %v1571_v57, %v1107_v28  ;;  %v1155_v14 = vmul.f32 %v2097_v6, %v1154_v54  ;;  %v1114_v17 = vmul.f32 %v2105_v58, %v2092_v63 }
 0x34e   :  { %v1267_v45 = vmul.f32 %v1152_v13, %v1994_v25  ;;  %v1132_v22 = vsel %vm1131_vm11, %v1569_v43, %v1128_v36  ;;  %v1135_v56 = vmul.f32 %v2101_v26, %v1134_v11  ;;  %1580 = vrsqrt.f32 %v2112_v52 }
 0x34f   :  { %v1265_v31 = vmul.f32 %v1132_v22, %v1996_v53  ;;  %v1112_v33 = vsel %vm1111_vm12, %v1571_v57, %v1108_v41  ;;  %v1156_v18 = vmul.f32 0.5, %v1155_v14  ;;  %v1115_v34 = vmul.f32 %v2105_v58, %v1114_v17 }
 0x350   :  { %1283 = vst [vmem:[#allocation5 + $0x20] sm:$0xff] %v1267_v45  ;;  %v1263_v19 = vmul.f32 %v1112_v33, %v1998_v5  ;;  %v1136_v39 = vmul.f32 0.5, %v1135_v56  ;;  %vm1140_vm15 = vweird.f32 %v2101_v26  ;;  %vm1120_vm0 = vweird.f32 %v2105_v58 }
 0x351   :  { %1281 = vst [vmem:[#allocation5 + $0x10] sm:$0xff] %v1265_v31  ;;  %v1157_v25 = vsub.f32 1.5, %v1156_v18  ;;  %v1116_v29 = vmul.f32 0.5, %v1115_v34  ;;  %v1078_v53 = vpop.xlane.xlu2 %1077  ;;  %v1076_v40 = vpop.xlane.xlu1 %1075  ;;  %1582 = vrsqrt.f32 %v2129_v4  ;;  %vm1141_vm4 = vmor %vm1139_vm2, %vm1140_vm15  ;;  %vm1189_vm7 = vweird.f32 %v2099_v46 }
 0x352   :  { %v1579_v9 = vpop.eup %1578  ;;  %1279 = vst [vmem:[#allocation5] sm:$0xff] %v1263_v19  ;;  %v1137_v42 = vsub.f32 1.5, %v1136_v39  ;;  %v2132_v5 = vmax.f32 %v1078_v53, 1e-24  ;;  %v2134_v50 = vmax.f32 %v1076_v40, 1e-24  ;;  %v1074_v43 = vpop.xlane.xlu0 %1073  ;;  %vm1121_vm5 = vmor %vm1119_vm3, %vm1120_vm0  ;;  %vm1179_vm10 = vweird.f32 %v2112_v52 }
 0x353   :  { %v1158_v62 = vmul.f32 %v2097_v6, %v1157_v25  ;;  %v1117_v57 = vsub.f32 1.5, %v1116_v29  ;;  %v1184_v59 = vmul.f32 %v1579_v9, %v2099_v46  ;;  %v2159_v55 = vmax.f32 %v1074_v43, 1e-24 }
 0x354   :  { %v1138_v30 = vmul.f32 %v2101_v26, %v1137_v42  ;;  %1584 = vrsqrt.f32 %v2132_v5  ;;  %v1581_v21 = vpop.eup %1580  ;;  %vm1190_vm6 = vweird.f32 %v1579_v9  ;;  %vm1169_vm11 = vweird.f32 %v2129_v4 }
 0x355   :  { %v1162_v0 = vsel %vm1161_vm1, %v2097_v6, %v1158_v62  ;;  %v1118_v3 = vmul.f32 %v2105_v58, %v1117_v57  ;;  %v1185_v2 = vmul.f32 %v1579_v9, %v1184_v59  ;;  %1586 = vrsqrt.f32 %v2134_v50  ;;  %vm1191_vm8 = vmor %vm1189_vm7, %vm1190_vm6 }
 0x356   :  { %v1268_v23 = vmul.f32 %v1162_v0, %v2012_v47  ;;  %v1142_v48 = vsel %vm1141_vm4, %v2101_v26, %v1138_v30  ;;  %v1174_v12 = vmul.f32 %v1581_v21, %v2112_v52  ;;  %1588 = vrsqrt.f32 %v2159_v55 }
 0x357   :  { %v1266_v49 = vmul.f32 %v1142_v48, %v2014_v20  ;;  %v1122_v63 = vsel %vm1121_vm5, %v2105_v58, %v1118_v3  ;;  %v1186_v44 = vmul.f32 0.5, %v1185_v2  ;;  %v1583_v26 = vpop.eup %1582  ;;  %vm1180_vm9 = vweird.f32 %v1581_v21 }
 0x358   :  { %1284 = vst [vmem:[#allocation5 + $0x28] sm:$0xff] %v1268_v23  ;;  %v1264_v61 = vmul.f32 %v1122_v63, %v2020_v1  ;;  %v1175_v6 = vmul.f32 %v1581_v21, %v1174_v12  ;;  %v1164_v36 = vmul.f32 %v1583_v26, %v2129_v4  ;;  %vm1181_vm12 = vmor %vm1179_vm10, %vm1180_vm9  ;;  %vm1170_vm13 = vweird.f32 %v1583_v26 }
 0x359   :  { %1282 = vst [vmem:[#allocation5 + $0x18] sm:$0xff] %v1266_v49  ;;  %v1187_v47 = vsub.f32 1.5, %v1186_v44  ;;  %v1084_v8 = vpop.xlane.xlu2 %1083  ;;  %v1082_v10 = vpop.xlane.xlu1 %1081  ;;  %vm1171_vm0 = vmor %vm1169_vm11, %vm1170_vm13  ;;  %vm1219_vm1 = vweird.f32 %v2132_v5  ;;  %vm1209_vm2 = vweird.f32 %v2134_v50  ;;  %vm1199_vm6 = vweird.f32 %v2159_v55 }
 0x35a   :  { %1280 = vst [vmem:[#allocation5 + $0x8] sm:$0xff] %v1264_v61  ;;  %v2162_v20 = vmax.f32 %v1084_v8, 1e-24  ;;  %v2164_v60 = vmax.f32 %v1082_v10, 1e-24  ;;  %v1080_v28 = vpop.xlane.xlu0 %1079  ;;  %v1585_v54 = vpop.eup %1584  ;;  %v1176_v1 = vmul.f32 0.5, %v1175_v6  ;;  %v1165_v17 = vmul.f32 %v1583_v26, %v1164_v36 }
 0x35b   :  { %v1188_v58 = vmul.f32 %v1579_v9, %v1187_v47  ;;  %v1587_v11 = vpop.eup %1586  ;;  %v1214_v13 = vmul.f32 %v1585_v54, %v2132_v5  ;;  %vm1220_vm14 = vweird.f32 %v1585_v54  ;;  %v2177_v19 = vmax.f32 %v1080_v28, 1e-24 }
 0x35c   :  { %1590 = vrsqrt.f32 %v2162_v20  ;;  %v1177_v14 = vsub.f32 1.5, %v1176_v1  ;;  %v1204_v45 = vmul.f32 %v1587_v11, %v2134_v50  ;;  %v1166_v31 = vmul.f32 0.5, %v1165_v17  ;;  %v1589_v18 = vpop.eup %1588  ;;  %vm1221_vm3 = vmor %vm1219_vm1, %vm1220_vm14 }
 0x35d   :  { %v1192_v41 = vsel %vm1191_vm8, %v1579_v9, %v1188_v58  ;;  %v1215_v46 = vmul.f32 %v1585_v54, %v1214_v13  ;;  %1592 = vrsqrt.f32 %v2164_v60  ;;  %v1194_v25 = vmul.f32 %v1589_v18, %v2159_v55 }
 0x35e   :  { %v1271_v22 = vmul.f32 %v1192_v41, %v2034_v51  ;;  %v1178_v56 = vmul.f32 %v1581_v21, %v1177_v14  ;;  %v1205_v33 = vmul.f32 %v1587_v11, %v1204_v45  ;;  %v1167_v39 = vsub.f32 1.5, %v1166_v31 }
 0x35f   :  { %v1216_v34 = vmul.f32 0.5, %v1215_v46  ;;  %vm1210_vm15 = vweird.f32 %v1587_v11  ;;  %1594 = vrsqrt.f32 %v2177_v19  ;;  %v1195_v62 = vmul.f32 %v1589_v18, %v1194_v25 }
 0x360   :  { %1287 = vst [vmem:[#allocation5 + $0x40] sm:$0xff] %v1271_v22  ;;  %v1182_v51 = vsel %vm1181_vm12, %v1581_v21, %v1178_v56  ;;  %v1206_v52 = vmul.f32 0.5, %v1205_v33  ;;  %v1168_v42 = vmul.f32 %v1583_v26, %v1167_v39  ;;  %vm1211_vm4 = vmor %vm1209_vm2, %vm1210_vm15  ;;  %vm1200_vm5 = vweird.f32 %v1589_v18 }
 0x361   :  { %v1270_v53 = vmul.f32 %v1182_v51, %v2036_v7  ;;  %v1217_v40 = vsub.f32 1.5, %v1216_v34  ;;  %v1196_v2 = vmul.f32 0.5, %v1195_v62  ;;  %vm1201_vm8 = vmor %vm1199_vm6, %vm1200_vm5  ;;  %vm1249_vm9 = vweird.f32 %v2162_v20 }
 0x362   :  { %v1591_v29 = vpop.eup %1590  ;;  %v1086_v9 = vpop.xlane.xlu0 %1085  ;;  %v1207_v43 = vsub.f32 1.5, %v1206_v52  ;;  %v1172_v0 = vsel %vm1171_vm0, %v1583_v26, %v1168_v42  ;;  %vm1239_vm12 = vweird.f32 %v2164_v60  ;;  %vm1229_vm15 = vweird.f32 %v2177_v19 }
 0x363   :  { %v1244_v57 = vmul.f32 %v1591_v29, %v2162_v20  ;;  %v1593_v59 = vpop.eup %1592  ;;  %1286 = vst [vmem:[#allocation5 + $0x38] sm:$0xff] %v1270_v53  ;;  %v1218_v30 = vmul.f32 %v1585_v54, %v1217_v40  ;;  %v2188_v7 = vmax.f32 %v1086_v9, 1e-24  ;;  %v1269_v23 = vmul.f32 %v1172_v0, %v2040_v15 }
 0x364   :  { %v1208_v3 = vmul.f32 %v1587_v11, %v1207_v43  ;;  %v1234_v4 = vmul.f32 %v1593_v59, %v2164_v60  ;;  %v1197_v50 = vsub.f32 1.5, %v1196_v2  ;;  %vm1250_vm7 = vweird.f32 %v1591_v29 }
 0x365   :  { %v1245_v21 = vmul.f32 %v1591_v29, %v1244_v57  ;;  %v1222_v48 = vsel %vm1221_vm3, %v1585_v54, %v1218_v30  ;;  %v1595_v44 = vpop.eup %1594  ;;  %1285 = vst [vmem:[#allocation5 + $0x30] sm:$0xff] %v1269_v23  ;;  %1596 = vrsqrt.f32 %v2188_v7  ;;  %vm1251_vm10 = vmor %vm1249_vm9, %vm1250_vm7  ;;  %vm1240_vm11 = vweird.f32 %v1593_v59 }
 0x366   :  { %v1274_v5 = vmul.f32 %v1222_v48, %v2052_v27  ;;  %v1212_v49 = vsel %vm1211_vm4, %v1587_v11, %v1208_v3  ;;  %v1235_v61 = vmul.f32 %v1593_v59, %v1234_v4  ;;  %v1198_v15 = vmul.f32 %v1589_v18, %v1197_v50  ;;  %vm1241_vm13 = vmor %vm1239_vm12, %vm1240_vm11 }
 0x367   :  { %v1246_v63 = vmul.f32 0.5, %v1245_v21  ;;  %v1273_v12 = vmul.f32 %v1212_v49, %v2054_v24  ;;  %v1224_v6 = vmul.f32 %v1595_v44, %v2177_v19  ;;  %vm1230_vm14 = vweird.f32 %v1595_v44 }
 0x368   :  { %1290 = vst [vmem:[#allocation5 + $0x58] sm:$0xff] %v1274_v5  ;;  %v1236_v27 = vmul.f32 0.5, %v1235_v61  ;;  %v1202_v8 = vsel %vm1201_vm8, %v1589_v18, %v1198_v15  ;;  %vm1231_vm0 = vmor %vm1229_vm15, %vm1230_vm14  ;;  %vm1259_vm2 = vweird.f32 %v2188_v7 }
 0x369   :  { %v1247_v47 = vsub.f32 1.5, %v1246_v63  ;;  %1289 = vst [vmem:[#allocation5 + $0x50] sm:$0xff] %v1273_v12  ;;  %v1225_v24 = vmul.f32 %v1595_v44, %v1224_v6  ;;  %v1272_v55 = vmul.f32 %v1202_v8, %v2058_v38 }
 0x36a   :  { %v1237_v26 = vsub.f32 1.5, %v1236_v27 }
 0x36b   :  { %v1248_v10 = vmul.f32 %v1591_v29, %v1247_v47  ;;  %v1226_v54 = vmul.f32 0.5, %v1225_v24  ;;  %v1597_v58 = vpop.eup %1596  ;;  %1288 = vst [vmem:[#allocation5 + $0x48] sm:$0xff] %v1272_v55 }
 0x36c   :  { %v1238_v36 = vmul.f32 %v1593_v59, %v1237_v26  ;;  %v1254_v20 = vmul.f32 %v1597_v58, %v2188_v7  ;;  %vm1260_vm1 = vweird.f32 %v1597_v58 }
 0x36d   :  { %v1252_v28 = vsel %vm1251_vm10, %v1591_v29, %v1248_v10  ;;  %v1227_v11 = vsub.f32 1.5, %v1226_v54  ;;  %vm1261_vm3 = vmor %vm1259_vm2, %vm1260_vm1 }
 0x36e   :  { %v1277_v1 = vmul.f32 %v1252_v28, %v2070_v35  ;;  %v1242_v13 = vsel %vm1241_vm13, %v1593_v59, %v1238_v36  ;;  %v1255_v14 = vmul.f32 %v1597_v58, %v1254_v20 }
 0x36f   :  { %v1276_v38 = vmul.f32 %v1242_v13, %v2072_v37  ;;  %v1228_v41 = vmul.f32 %v1595_v44, %v1227_v11 }
 0x370   :  { %1293 = vst [vmem:[#allocation5 + $0x70] sm:$0xff] %v1277_v1  ;;  %v1256_v35 = vmul.f32 0.5, %v1255_v14 }
 0x371   :  { %1292 = vst [vmem:[#allocation5 + $0x68] sm:$0xff] %v1276_v38  ;;  %v1232_v17 = vsel %vm1231_vm0, %v1595_v44, %v1228_v41 }
 0x372   :  { %v1275_v45 = vmul.f32 %v1232_v17, %v2074_v16  ;;  %v1257_v60 = vsub.f32 1.5, %v1256_v35 }
 0x374   :  { %1291 = vst [vmem:[#allocation5 + $0x60] sm:$0xff] %v1275_v45  ;;  %v1258_v37 = vmul.f32 %v1597_v58, %v1257_v60 }
 0x376   :  { %v1262_v22 = vsel %vm1261_vm3, %v1597_v58, %v1258_v37 }
 0x377   :  { %v1278_v46 = vmul.f32 %v1262_v22, %v2084_v32 }
 0x379   :  { %1294 = vst [vmem:[#allocation5 + $0x78] sm:$0xff] %v1278_v46 }
 0x37a   :  { %1307 = dma.vmem_to_hbm [thread:$0]  %s1300_s28, 2048, %s1302_s30, [#allocation4], %s1654_s6, %s1654_s6, %s1655_s7  }
 0x37b   :  { %1648 = dma.done.wait [#allocation4], 2048  }
 0x37c   :  { %1649 = vsyncadd [#allocation4], 4294965248 }
 0x37d   :  { %1312 = vsyncpa [#allocation3], 1 }
 0x37e   :  { %1313 = vsyncpa [#allocation4], 1 }

</bundles_post_ra>
